<compile_context>
chip_gen: v7x
topology: tpu7x:2x2x1
jax: 0.10.0
libtpu: 0.0.40
codegen_flags: <defaults>
</compile_context>

<pallas_src>
import functools

import jax
import jax.numpy as jnp
from jax.experimental import pallas as pl
from jax.experimental.pallas import tpu as pltpu

_BN_EPS = 1e-5
_SQRT_2_OVER_PI = 0.7978845608028654


def _round_up(x, m):
    return (x + m - 1) // m * m


def _out_open_ended_kernel(wt_ref, q_ref, v_ref, w1q_ref, w1v_ref, b1_ref,
                           w2_ref, b2_ref, out_ref, h_ref, *, inv_tv):
    j = pl.program_id(1)

    # The hidden (post-GELU) slab only depends on the batch tile, not on the
    # answer tile: compute it once per batch tile (j == 0) and cache in VMEM.
    @pl.when(j == 0)
    def _hidden():
        # masked temporal mean of the question embedding (weights precomputed
        # host-side: mask / qlen, with a qlen==0 guard)
        q_mean = jnp.sum(q_ref[...] * wt_ref[...][:, :, None], axis=0)   # (tb, D)
        # temporal mean of the visual embedding
        v_mean = jnp.sum(v_ref[...], axis=0) * inv_tv                    # (tb, D)

        # Linear(2D -> D): concat([q_mean, v_mean]) realised as a split matmul,
        # bf16 operands on the MXU, f32 accumulation.
        h = (jnp.dot(q_mean.astype(jnp.bfloat16), w1q_ref[...],
                     preferred_element_type=jnp.float32)
             + jnp.dot(v_mean.astype(jnp.bfloat16), w1v_ref[...],
                       preferred_element_type=jnp.float32)
             + b1_ref[...])

        # TODO(synk): PyTorch nn.GELU() default is the exact erf GELU; tanh
        # approximation is used here for TPU transcendental (EUP) support.
        g = 0.5 * h * (1.0 + jnp.tanh(_SQRT_2_OVER_PI * (h + 0.044715 * h * h * h)))

        # BatchNorm1d (eval, running stats) is folded into w2/b2 in the wrapper.
        h_ref[...] = g.astype(jnp.bfloat16)

    # Linear(D -> num_answers), one lane-dense answer tile per grid step.
    out = (jnp.dot(h_ref[...], w2_ref[...], preferred_element_type=jnp.float32)
           + b2_ref[...])
    out_ref[...] = out.astype(out_ref.dtype)


def out_open_ended(question_embedding_v, visual_embedding_qu, question_len, params):
    q = question_embedding_v
    v = visual_embedding_qu
    T_q, B, D = q.shape
    T_v = v.shape[0]
    A = params["w2"].shape[1]

    # --- fold eval-mode BatchNorm1d into the second Linear (exact) -----------
    scale = params["gamma"] * jax.lax.rsqrt(params["rvar"] + _BN_EPS)      # (1, D)
    shift = params["beta"] - params["rmean"] * scale                       # (1, D)
    w2_eff = scale.reshape(D, 1) * params["w2"]                            # (D, A)
    b2_eff = shift @ params["w2"] + params["b2"]                           # (1, A)

    # --- tile sizes: batch rows on sublanes, answers lane-dense --------------
    if B <= 128:
        tb = _round_up(B, 8)
        B_pad = tb
    else:
        tb = 128
        B_pad = _round_up(B, tb)
    if A <= 512:
        tA = _round_up(A, 128)
        A_pad = tA
    else:
        tA = 512
        A_pad = _round_up(A, tA)

    # --- temporal weights for the masked question mean (tiny, host-side) -----
    qlen = question_len.astype(jnp.int32)
    mask = (jnp.arange(T_q, dtype=jnp.int32)[:, None] < qlen[None, :]).astype(jnp.float32)
    # qlen == 0 would give NaN in PyTorch (mean of empty); the guard yields 0.
    wt = mask / jnp.maximum(qlen, 1).astype(jnp.float32)[None, :]          # (T_q, B)

    # --- pad batch / answer dims to the tile grid -----------------------------
    q_p = jnp.pad(q, ((0, 0), (0, B_pad - B), (0, 0)))
    v_p = jnp.pad(v, ((0, 0), (0, B_pad - B), (0, 0)))
    wt_p = jnp.pad(wt, ((0, 0), (0, B_pad - B)))
    w2_p = jnp.pad(w2_eff, ((0, 0), (0, A_pad - A))).astype(jnp.bfloat16)
    b2_p = jnp.pad(b2_eff, ((0, 0), (0, A_pad - A)))

    # bf16 MXU operands (f32 accumulation inside the kernel); w1 pre-split.
    w1q = params["w1"][:D, :].astype(jnp.bfloat16)
    w1v = params["w1"][D:, :].astype(jnp.bfloat16)
    b1 = params["b1"]

    grid = (B_pad // tb, A_pad // tA)
    kernel = functools.partial(_out_open_ended_kernel, inv_tv=1.0 / T_v)

    cost = pl.CostEstimate(
        flops=int(2 * B_pad * (2 * D * D + D * A_pad)),
        transcendentals=int(B_pad * D),
        bytes_accessed=int((T_q + T_v) * B_pad * D * 4 + T_q * B_pad * 4
                           + 2 * D * D * 2 + D * A_pad * 2
                           + (D + A_pad) * 4 + B_pad * A_pad * 4),
    )

    out = pl.pallas_call(
        kernel,
        out_shape=jax.ShapeDtypeStruct((B_pad, A_pad), jnp.float32),
        grid_spec=pltpu.PrefetchScalarGridSpec(
            num_scalar_prefetch=0,
            grid=grid,
            in_specs=[
                pl.BlockSpec((T_q, tb), lambda i, j: (0, i)),        # temporal weights
                pl.BlockSpec((T_q, tb, D), lambda i, j: (0, i, 0)),  # question emb
                pl.BlockSpec((T_v, tb, D), lambda i, j: (0, i, 0)),  # visual emb
                pl.BlockSpec((D, D), lambda i, j: (0, 0)),           # w1 (question half)
                pl.BlockSpec((D, D), lambda i, j: (0, 0)),           # w1 (visual half)
                pl.BlockSpec((1, D), lambda i, j: (0, 0)),           # b1
                pl.BlockSpec((D, tA), lambda i, j: (0, j)),          # w2 (BN folded)
                pl.BlockSpec((1, tA), lambda i, j: (0, j)),          # b2 (BN folded)
            ],
            out_specs=pl.BlockSpec((tb, tA), lambda i, j: (i, j)),
            scratch_shapes=[pltpu.VMEM((tb, D), jnp.bfloat16)],
        ),
        compiler_params=pltpu.CompilerParams(
            dimension_semantics=("parallel", "arbitrary"),
            vmem_limit_bytes=32 * 1024 * 1024,
        ),
        cost_estimate=cost,
    )(wt_p, q_p, v_p, w1q, w1v, b1, w2_p, b2_p)

    return out[:B, :A]


def init_params(key, embed_dim, num_answers):
    """Deterministic init mirroring the PyTorch __init__ (xavier_normal, zeros)."""
    k1, k2 = jax.random.split(key)
    std1 = (2.0 / (2 * embed_dim + embed_dim)) ** 0.5   # Linear(2D, D) xavier_normal
    std2 = (2.0 / (embed_dim + num_answers)) ** 0.5     # Linear(D, A) xavier_normal
    return {
        "w1": std1 * jax.random.normal(k1, (2 * embed_dim, embed_dim), jnp.float32),
        "b1": jnp.zeros((1, embed_dim), jnp.float32),
        "w2": std2 * jax.random.normal(k2, (embed_dim, num_answers), jnp.float32),
        "b2": jnp.zeros((1, num_answers), jnp.float32),
        "gamma": jnp.ones((1, embed_dim), jnp.float32),
        "beta": jnp.zeros((1, embed_dim), jnp.float32),
        "rmean": jnp.zeros((1, embed_dim), jnp.float32),
        "rvar": jnp.ones((1, embed_dim), jnp.float32),
    }


def reference(q, v, qlen, params):
    """Pure-JAX f32 reference of the same forward pass (for correctness check)."""
    T_q, B, D = q.shape
    mask = (jnp.arange(T_q)[:, None] < qlen[None, :]).astype(jnp.float32)   # (T_q, B)
    q_mean = (jnp.sum(q * mask[:, :, None], axis=0)
              / jnp.maximum(qlen, 1).astype(jnp.float32)[:, None])
    v_mean = jnp.mean(v, axis=0)
    x = jnp.concatenate([q_mean, v_mean], axis=1)
    h = x @ params["w1"] + params["b1"]
    g = 0.5 * h * (1.0 + jnp.tanh(_SQRT_2_OVER_PI * (h + 0.044715 * h ** 3)))
    bn = ((g - params["rmean"]) * jax.lax.rsqrt(params["rvar"] + _BN_EPS)
          * params["gamma"] + params["beta"])
    return bn @ params["w2"] + params["b2"]


if __name__ == "__main__":
    # Small shapes; A=600 exercises answer-dim padding + a 2-tile answer grid
    # (so the j>0 scratch-reuse path runs), B=4 exercises batch padding to 8.
    T_q, T_v, B, D, A = 8, 6, 4, 32, 600

    key = jax.random.PRNGKey(0)
    kq, kv, kp = jax.random.split(key, 3)
    question_embedding_v = jax.random.normal(kq, (T_q, B, D), jnp.float32)
    visual_embedding_qu = jax.random.normal(kv, (T_v, B, D), jnp.float32)
    question_len = jnp.array([3, 8, 5, 1], jnp.int32)

    params = init_params(kp, D, A)

    out = out_open_ended(question_embedding_v, visual_embedding_qu,
                         question_len, params)
    out = jax.block_until_ready(out)

    ref = reference(question_embedding_v, visual_embedding_qu, question_len, params)
    assert out.shape == (B, A)
    err = float(jnp.max(jnp.abs(out - ref)))
    # bf16 MXU operands with f32 accumulation vs. an all-f32 reference.
    assert err < 1e-2, f"mismatch vs reference: max abs err {err}"

    print("KERNEL_OK")
</pallas_src>

<mosaic_0001>
module attributes {stable_mosaic.version = 11 : i64} {
  func.func @_out_open_ended_kernel(%arg0: i32, %arg1: i32, %arg2: memref<8x8xf32, #tpu.memory_space<vmem>>, %arg3: memref<8x8x32xf32, #tpu.memory_space<vmem>>, %arg4: memref<6x8x32xf32, #tpu.memory_space<vmem>>, %arg5: memref<32x32xbf16, #tpu.memory_space<vmem>>, %arg6: memref<32x32xbf16, #tpu.memory_space<vmem>>, %arg7: memref<1x32xf32, #tpu.memory_space<vmem>>, %arg8: memref<32x512xbf16, #tpu.memory_space<vmem>>, %arg9: memref<1x512xf32, #tpu.memory_space<vmem>>, %arg10: memref<8x512xf32, #tpu.memory_space<vmem>>, %arg11: memref<8x32xbf16, #tpu.memory_space<vmem>>) attributes {dimension_semantics = [#tpu.dimension_semantics<parallel>, #tpu.dimension_semantics<arbitrary>], iteration_bounds = array<i64: 1, 2>, scalar_prefetch = 0 : i64, scratch_operands = 1 : i64, tpu.core_type = #tpu.core_type<tc>, window_params = [{transform_indices = @transform_0, window_bounds = array<i64: 8, 8>}, {transform_indices = @transform_1, window_bounds = array<i64: 8, 8, 32>}, {transform_indices = @transform_2, window_bounds = array<i64: 6, 8, 32>}, {pipeline_mode = #tpu.pipeline_mode<synchronous>, transform_indices = @transform_3, window_bounds = array<i64: 32, 32>}, {pipeline_mode = #tpu.pipeline_mode<synchronous>, transform_indices = @transform_4, window_bounds = array<i64: 32, 32>}, {pipeline_mode = #tpu.pipeline_mode<synchronous>, transform_indices = @transform_5, window_bounds = array<i64: 1, 32>}, {transform_indices = @transform_6, window_bounds = array<i64: 32, 512>}, {transform_indices = @transform_7, window_bounds = array<i64: 1, 512>}, {transform_indices = @transform_8, window_bounds = array<i64: 8, 512>}]} {
    %c0_i32 = arith.constant 0 : i32
    %0 = arith.cmpi eq, %arg1, %c0_i32 : i32
    %1 = arith.extui %0 : i1 to i32
    %c0_i32_0 = arith.constant 0 : i32
    %2 = arith.cmpi ne, %1, %c0_i32_0 : i32
    scf.if %2 {
      %c0_8 = arith.constant 0 : index
      %c0_9 = arith.constant 0 : index
      %c0_10 = arith.constant 0 : index
      %10 = vector.load %arg3[%c0_8, %c0_9, %c0_10] : memref<8x8x32xf32, #tpu.memory_space<vmem>>, vector<8x8x32xf32>
      %c0_11 = arith.constant 0 : index
      %c0_12 = arith.constant 0 : index
      %11 = vector.load %arg2[%c0_11, %c0_12] : memref<8x8xf32, #tpu.memory_space<vmem>>, vector<8x8xf32>
      %12 = vector.shape_cast %11 : vector<8x8xf32> to vector<8x8x1xf32>
      %13 = vector.broadcast %12 : vector<8x8x1xf32> to vector<8x8x32xf32>
      %14 = arith.mulf %10, %13 : vector<8x8x32xf32>
      %cst_13 = arith.constant dense<0.000000e+00> : vector<8x32xf32>
      %15 = vector.multi_reduction <add>, %14, %cst_13 [0] : vector<8x8x32xf32> to vector<8x32xf32>
      %c0_14 = arith.constant 0 : index
      %c0_15 = arith.constant 0 : index
      %c0_16 = arith.constant 0 : index
      %16 = vector.load %arg4[%c0_14, %c0_15, %c0_16] : memref<6x8x32xf32, #tpu.memory_space<vmem>>, vector<6x8x32xf32>
      %cst_17 = arith.constant dense<0.000000e+00> : vector<8x32xf32>
      %17 = vector.multi_reduction <add>, %16, %cst_17 [0] : vector<6x8x32xf32> to vector<8x32xf32>
      %cst_18 = arith.constant 0.166666672 : f32
      %18 = vector.broadcast %cst_18 : f32 to vector<8x32xf32>
      %19 = arith.mulf %17, %18 : vector<8x32xf32>
      %20 = arith.truncf %15 : vector<8x32xf32> to vector<8x32xbf16>
      %c0_19 = arith.constant 0 : index
      %c0_20 = arith.constant 0 : index
      %21 = vector.load %arg5[%c0_19, %c0_20] : memref<32x32xbf16, #tpu.memory_space<vmem>>, vector<32x32xbf16>
      %cst_21 = arith.constant dense<0.000000e+00> : vector<8x32xf32>
      %22 = tpu.matmul %20, %21, %cst_21 {dimension_numbers = #tpu.dot_dimension_numbers<[1], [0], [0], [1], [0, 0, 1, 1], [], []>} : vector<8x32xbf16>, vector<32x32xbf16>, vector<8x32xf32> -> vector<8x32xf32>
      %23 = arith.truncf %19 : vector<8x32xf32> to vector<8x32xbf16>
      %c0_22 = arith.constant 0 : index
      %c0_23 = arith.constant 0 : index
      %24 = vector.load %arg6[%c0_22, %c0_23] : memref<32x32xbf16, #tpu.memory_space<vmem>>, vector<32x32xbf16>
      %cst_24 = arith.constant dense<0.000000e+00> : vector<8x32xf32>
      %25 = tpu.matmul %23, %24, %cst_24 {dimension_numbers = #tpu.dot_dimension_numbers<[1], [0], [0], [1], [0, 0, 1, 1], [], []>} : vector<8x32xbf16>, vector<32x32xbf16>, vector<8x32xf32> -> vector<8x32xf32>
      %26 = arith.addf %22, %25 : vector<8x32xf32>
      %c0_25 = arith.constant 0 : index
      %c0_26 = arith.constant 0 : index
      %27 = vector.load %arg7[%c0_25, %c0_26] : memref<1x32xf32, #tpu.memory_space<vmem>>, vector<1x32xf32>
      %28 = vector.broadcast %27 : vector<1x32xf32> to vector<8x32xf32>
      %29 = arith.addf %26, %28 : vector<8x32xf32>
      %cst_27 = arith.constant 5.000000e-01 : f32
      %30 = vector.broadcast %cst_27 : f32 to vector<8x32xf32>
      %31 = arith.mulf %30, %29 : vector<8x32xf32>
      %cst_28 = arith.constant 4.471500e-02 : f32
      %32 = vector.broadcast %cst_28 : f32 to vector<8x32xf32>
      %33 = arith.mulf %32, %29 : vector<8x32xf32>
      %34 = arith.mulf %33, %29 : vector<8x32xf32>
      %35 = arith.mulf %34, %29 : vector<8x32xf32>
      %36 = arith.addf %29, %35 : vector<8x32xf32>
      %cst_29 = arith.constant 0.797884583 : f32
      %37 = vector.broadcast %cst_29 : f32 to vector<8x32xf32>
      %38 = arith.mulf %37, %36 : vector<8x32xf32>
      %39 = math.tanh %38 : vector<8x32xf32>
      %cst_30 = arith.constant 1.000000e+00 : f32
      %40 = vector.broadcast %cst_30 : f32 to vector<8x32xf32>
      %41 = arith.addf %40, %39 : vector<8x32xf32>
      %42 = arith.mulf %31, %41 : vector<8x32xf32>
      %43 = arith.truncf %42 : vector<8x32xf32> to vector<8x32xbf16>
      %c0_31 = arith.constant 0 : index
      %c0_32 = arith.constant 0 : index
      %44 = vector.load %arg11[%c0_31, %c0_32] : memref<8x32xbf16, #tpu.memory_space<vmem>>, vector<8x32xbf16>
      tpu.vector_store %arg11[%c0_31, %c0_32], %43 {strides = array<i32>} : memref<8x32xbf16, #tpu.memory_space<vmem>>, vector<8x32xbf16>,
    } else {
    }
    %c0 = arith.constant 0 : index
    %c0_1 = arith.constant 0 : index
    %3 = vector.load %arg11[%c0, %c0_1] : memref<8x32xbf16, #tpu.memory_space<vmem>>, vector<8x32xbf16>
    %c0_2 = arith.constant 0 : index
    %c0_3 = arith.constant 0 : index
    %4 = vector.load %arg8[%c0_2, %c0_3] : memref<32x512xbf16, #tpu.memory_space<vmem>>, vector<32x512xbf16>
    %cst = arith.constant dense<0.000000e+00> : vector<8x512xf32>
    %5 = tpu.matmul %3, %4, %cst {dimension_numbers = #tpu.dot_dimension_numbers<[1], [0], [0], [1], [0, 0, 1, 1], [], []>} : vector<8x32xbf16>, vector<32x512xbf16>, vector<8x512xf32> -> vector<8x512xf32>
    %c0_4 = arith.constant 0 : index
    %c0_5 = arith.constant 0 : index
    %6 = vector.load %arg9[%c0_4, %c0_5] : memref<1x512xf32, #tpu.memory_space<vmem>>, vector<1x512xf32>
    %7 = vector.broadcast %6 : vector<1x512xf32> to vector<8x512xf32>
    %8 = arith.addf %5, %7 : vector<8x512xf32>
    %c0_6 = arith.constant 0 : index
    %c0_7 = arith.constant 0 : index
    %9 = vector.load %arg10[%c0_6, %c0_7] : memref<8x512xf32, #tpu.memory_space<vmem>>, vector<8x512xf32>
    tpu.vector_store %arg10[%c0_6, %c0_7], %8 {strides = array<i32>} : memref<8x512xf32, #tpu.memory_space<vmem>>, vector<8x512xf32>,
    return
  }
  func.func @transform_0(%arg0: i32, %arg1: i32) -> (i32, i32) {
    %c0_i32 = arith.constant 0 : i32
    %c0_i32_0 = arith.constant 0 : i32
    return %c0_i32, %arg0 : i32, i32
  }
  func.func @transform_1(%arg0: i32, %arg1: i32) -> (i32, i32, i32) {
    %c0_i32 = arith.constant 0 : i32
    %c0_i32_0 = arith.constant 0 : i32
    %c0_i32_1 = arith.constant 0 : i32
    return %c0_i32, %arg0, %c0_i32_0 : i32, i32, i32
  }
  func.func @transform_2(%arg0: i32, %arg1: i32) -> (i32, i32, i32) {
    %c0_i32 = arith.constant 0 : i32
    %c0_i32_0 = arith.constant 0 : i32
    %c0_i32_1 = arith.constant 0 : i32
    return %c0_i32, %arg0, %c0_i32_0 : i32, i32, i32
  }
  func.func @transform_3(%arg0: i32, %arg1: i32) -> (i32, i32) {
    %c0_i32 = arith.constant 0 : i32
    %c0_i32_0 = arith.constant 0 : i32
    %c0_i32_1 = arith.constant 0 : i32
    return %c0_i32, %c0_i32_0 : i32, i32
  }
  func.func @transform_4(%arg0: i32, %arg1: i32) -> (i32, i32) {
    %c0_i32 = arith.constant 0 : i32
    %c0_i32_0 = arith.constant 0 : i32
    %c0_i32_1 = arith.constant 0 : i32
    return %c0_i32, %c0_i32_0 : i32, i32
  }
  func.func @transform_5(%arg0: i32, %arg1: i32) -> (i32, i32) {
    %c0_i32 = arith.constant 0 : i32
    %c0_i32_0 = arith.constant 0 : i32
    %c0_i32_1 = arith.constant 0 : i32
    return %c0_i32, %c0_i32_0 : i32, i32
  }
  func.func @transform_6(%arg0: i32, %arg1: i32) -> (i32, i32) {
    %c0_i32 = arith.constant 0 : i32
    %c0_i32_0 = arith.constant 0 : i32
    return %c0_i32, %arg1 : i32, i32
  }
  func.func @transform_7(%arg0: i32, %arg1: i32) -> (i32, i32) {
    %c0_i32 = arith.constant 0 : i32
    %c0_i32_0 = arith.constant 0 : i32
    return %c0_i32, %arg1 : i32, i32
  }
  func.func @transform_8(%arg0: i32, %arg1: i32) -> (i32, i32) {
    %c0_i32 = arith.constant 0 : i32
    return %arg0, %arg1 : i32, i32
  }
}

</mosaic_0001>

<bundles_post_ra>
// kernel: tpu_custom_call.1
= control target key start
LH: loop header
LB: loop body
LE: loop exit
PB: predicated region body
PF: predicated region fallthrough
CT: control target
= control target key end

     0   :  { %s1941_s0 = inlined_call_operand.hbm [shape: f32[8,8], index: 0, kind: input, shape index: {}]   ;;  %s1942_s1 = inlined_call_operand.hbm [shape: f32[8,8,32], index: 1, kind: input, shape index: {}]   ;;  %s1943_s2 = inlined_call_operand.hbm [shape: f32[6,8,32], index: 2, kind: input, shape index: {}]   ;;  %s1944_s3 = inlined_call_operand.hbm [shape: bf16[32,32], index: 3, kind: input, shape index: {}]   ;;  %s1945_s4 = inlined_call_operand.hbm [shape: bf16[32,32], index: 4, kind: input, shape index: {}]   ;;  %s1946_s5 = inlined_call_operand.vmem [shape: f32[1,32], index: 5, kind: input, shape index: {}]   ;;  %s1947_s6 = inlined_call_operand.hbm [shape: bf16[32,1024], index: 6, kind: input, shape index: {}]   ;;  %s1948_s7 = inlined_call_operand.vmem [shape: f32[1,1024], index: 7, kind: input, shape index: {}]   ;;  %s1949_s8 = inlined_call_operand.hbm [shape: f32[8,1024], index: 8, kind: output, shape index: {}]  }
   0x1   :  { %1960 = sst [smem:[#allocation22_spill]] %s1942_s1 }
   0x2   :  { %1961 = sst [smem:[#allocation23_spill]] %s1946_s5 }
   0x3   :  { %1962 = sst [smem:[#allocation24_spill]] %s1949_s8 }
   0x4   :  { %13 = vsyncpa [#allocation4], 0 }
   0x5   :  { %14 = vsyncpa [#allocation7], 0 }
   0x6   :  { %15 = vsyncpa [#allocation10], 0 }
   0x7   :  { %16 = vsyncpa [#allocation13], 0 }
   0x8   :  { %18 = vsyncpa [#allocation13 + $0x1], 0 }
   0x9   :  { %19 = vsyncpa [#allocation5], 0 }
   0xa   :  { %21 = vsyncpa [#allocation5 + $0x1], 0  ;;  %s1564_s27 = smov 0   ;;  %s1566_s28 = smov 0  }
   0xb   :  { %s1568_s29 = smov 0   ;;  %s1570_s30 = smov 0  }
   0xc   :  { %s1572_s9 = smov 0   ;;  %s1574_s10 = smov 0  }
   0xd LB: > { %1963 = sst [smem:[#allocation20_spill]] %s1480_s27  ;;  %s1027_s11 = sadd.s32 4294967295, %s1500_s10   ;;  %s1500_s10 = sphi %s1574_s10, %s27_s10   ;;  %s1496_s9 = sphi %s1572_s9, %s1993_s9   ;;  %s1492_s30 = sphi %s1570_s30, %s1992_s30   ;;  %s1488_s29 = sphi %s1568_s29, %s1991_s29   ;;  %s1484_s28 = sphi %s1566_s28, %s1990_s28   ;;  %s1480_s27 = sphi %s1564_s27, %s1989_s27  }
   0xe   : > { %s1028_s12 = sadd.s32 4294967294, %s1500_s10   ;;  %p200_p0 = scmp.ne.s32.totalorder %s1484_s28, %s1480_s27 }
   0xf   : > { %p1598_p1 = scmp.eq.s32.totalorder %s1027_s11, 0  ;;  %p1602_p2 = scmp.eq.s32.totalorder %s1027_s11, 1 }
  0x10   : > { %p258_p3 = scmp.eq.s32.totalorder %s1028_s12, 1  ;;  %p1029_p5 = scmp.ge.s32.totalorder %s1500_s10, 1 }
  0x11   : > { %s1964_s13 = scalar_select %p1598_p1, 1, 0 }
  0x12   : > { %s1965_s14 = scalar_select %p1602_p2, 1, 0 }
  0x13   : > { %p1608_p4 = por %p1598_p1, %p200_p0  ;;  %p1613_p6 = por %p258_p3, %p200_p0 }
  0x14   : > { %p265_p7 = scmp.lt.s32.totalorder %s1500_s10, 3  ;;  %s1502_s18 = smov [#allocation6]  }
  0x15   : > { %s1966_s15 = scalar_select %p1608_p4, 1, 0 }
  0x16   : > { %s1967_s16 = scalar_select %p1613_p6, 1, 0 }
  0x17   : > { %p1618_p8 = pnand %p1029_p5, %p265_p7  ;;  %s292_s19 = sshll.u32 %s1502_s18, 4  ;;  %s1622_s19 = int_to_ptr.vmem [resolvable:$true] %s292_s19 }
  0x18   : > { %1968 = sst [smem:[#allocation21_spill]] %s1967_s16  ;;  %s1503_s21 = smov [#allocation9]  }
  0x19   : > { %s1969_s17 = scalar_select %p1618_p8, 1, 0 }
  0x1a   : > { %p1119_p9 = pneg %p1618_p8  ;;  %s320_s22 = sshll.u32 %s1503_s21, 4  ;;  %s1633_s22 = int_to_ptr.vmem [resolvable:$true] %s320_s22 }
  0x1b   : > { %s1971_s1 = sld [smem:[#allocation22_spill]] }
  0x1c   : > { %p1629_p11 = pnand %p1119_p9, %p1598_p1 }
  0x1e   : > { %p1643_p13 = pneg %p1629_p11 }
  0x21   : > { %s1236_s25 = scalar_lea.hbm %s1971_s1, 1024 }
  0x22   : > { %p1237_p12 = scmp.ne.s32.totalorder %s1971_s1, %s1236_s25  ;;  %p1243_p5 = scmp.lt.u32.totalorder %s1236_s25, %s1971_s1 }
  0x24   : > { %p1239_p0 = pnand %p1643_p13, %p1237_p12 }
  0x26   : > { %p1240_p3 = pneg %p1239_p0 }
  0x28   : > { %p1245_p7 = pnand %p1243_p5, %p1240_p3 }
  0x2a   : > { %1248 = shalt.err (!%p1245_p7)
}
  0x2b   : > { %s1249_s23 = scalar_lea.vmem %s1622_s19, 1024  ;;  %p1257_p4 = scmp.lt.s32.totalorder %s1622_s19, %s1622_s19 }
  0x2c   : > { %p1250_p9 = scmp.ne.s32.totalorder %s1622_s19, %s1249_s23  ;;  %p1258_p1 = scmp.lt.s32.totalorder %s1249_s23, %s1249_s23 }
  0x2e   : > { %p1252_p10 = pnand %p1250_p9, %p1643_p13  ;;  %p1259_p12 = por %p1258_p1, %p1257_p4 }
  0x30   : > { %p1253_p6 = pneg %p1252_p10 }
  0x32   : > { %p1260_p0 = pnand %p1259_p12, %p1253_p6 }
  0x34   : > { %1263 = shalt.err (!%p1260_p0)
}
  0x35   : > { %s1956_s24 = smov 128   ;;  %s1957_s25 = smov 8  }
  0x36   : > { %1125 = dma.hbm_to_vmem [thread:$0]  (!%p1629_p11), %s1971_s1, 1024, %s1622_s19, [#allocation7], %s1956_s24, %s1956_s24, %s1957_s25  }
  0x37   : > { %s1264_s23 = scalar_lea.hbm %s1944_s3, 256 }
  0x38   : > { %p1265_p1 = scmp.ne.s32.totalorder %s1944_s3, %s1264_s23  ;;  %p1271_p10 = scmp.lt.u32.totalorder %s1264_s23, %s1944_s3 }
  0x3a   : > { %p1267_p4 = pnand %p1265_p1, %p1643_p13 }
  0x3c   : > { %p1268_p6 = pneg %p1267_p4 }
  0x3e   : > { %p1273_p3 = pnand %p1271_p10, %p1268_p6 }
  0x40   : > { %1276 = shalt.err (!%p1273_p3)
}
  0x41   : > { %s1277_s19 = scalar_lea.vmem %s1633_s22, 256  ;;  %p1285_p12 = scmp.lt.s32.totalorder %s1633_s22, %s1633_s22 }
  0x42   : > { %p1278_p5 = scmp.ne.s32.totalorder %s1633_s22, %s1277_s19  ;;  %p1286_p0 = scmp.lt.s32.totalorder %s1277_s19, %s1277_s19 }
  0x44   : > { %p1280_p7 = pnand %p1278_p5, %p1643_p13  ;;  %p1287_p1 = por %p1286_p0, %p1285_p12 }
  0x46   : > { %p1281_p9 = pneg %p1280_p7 }
  0x48   : > { %p1288_p4 = pnand %p1287_p1, %p1281_p9 }
  0x4a   : > { %1291 = shalt.err (!%p1288_p4)
}
  0x4b   : > { %s1959_s27 = smov 64   ;;  %s1507_s5 = smov 4  }
  0x4c   : > { %1131 = dma.hbm_to_vmem [thread:$0]  (!%p1629_p11), %s1944_s3, 256, %s1633_s22, [#allocation10], %s1959_s27, %s1959_s27, %s1507_s5  }
  0x4d   : > { %s1508_s26 = smov [#allocation3]   ;;  %s1292_s23 = scalar_lea.hbm %s1941_s0, 128 }
  0x4e   : > { %s280_s11 = sshll.u32 %s1508_s26, 4  ;;  %p1293_p6 = scmp.ne.s32.totalorder %s1941_s0, %s1292_s23  ;;  %s281_s11 = int_to_ptr.vmem [resolvable:$true] %s280_s11 }
  0x4f   : > { %p1299_p5 = scmp.lt.u32.totalorder %s1292_s23, %s1941_s0 }
  0x50   : > { %p1295_p10 = pnand %p1293_p6, %p1643_p13 }
  0x52   : > { %p1296_p3 = pneg %p1295_p10 }
  0x54   : > { %p1301_p7 = pnand %p1299_p5, %p1296_p3 }
  0x56   : > { %1304 = shalt.err (!%p1301_p7)
}
  0x57   : > { %s1305_s22 = scalar_lea.vmem %s281_s11, 128  ;;  %p1313_p1 = scmp.lt.s32.totalorder %s281_s11, %s281_s11 }
  0x58   : > { %p1306_p9 = scmp.ne.s32.totalorder %s281_s11, %s1305_s22  ;;  %p1314_p4 = scmp.lt.s32.totalorder %s1305_s22, %s1305_s22 }
  0x5a   : > { %p1308_p12 = pnand %p1306_p9, %p1643_p13  ;;  %p1315_p8 = por %p1314_p4, %p1313_p1 }
  0x5c   : > { %p1309_p0 = pneg %p1308_p12 }
  0x5e   : > { %p1316_p2 = pnand %p1315_p8, %p1309_p0 }
  0x60   : > { %1319 = shalt.err (!%p1316_p2)
}
  0x61   : > { %1122 = dma.hbm_to_vmem [thread:$0]  (!%p1629_p11), %s1941_s0, 128, %s281_s11, [#allocation4]  }
  0x62   : > { %s1509_s1 = smov [#allocation8]   ;;  %s1510_s16 = smov [#allocation11]  }
  0x63   : > { %s307_s25 = sshll.u32 %s1509_s1, 4  ;;  %s333_s26 = sshll.u32 %s1510_s16, 4  ;;  %s308_s25 = int_to_ptr.vmem [resolvable:$true] %s307_s25  ;;  %s334_s26 = int_to_ptr.vmem [resolvable:$true] %s333_s26 }
  0x64   : > { %s1320_s23 = scalar_lea.hbm %s1943_s2, 768 }
  0x65   : > { %p1321_p2 = scmp.ne.s32.totalorder %s1943_s2, %s1320_s23  ;;  %p1327_p10 = scmp.lt.u32.totalorder %s1320_s23, %s1943_s2 }
  0x67   : > { %p1323_p8 = pnand %p1321_p2, %p1643_p13 }
  0x69   : > { %p1324_p6 = pneg %p1323_p8 }
  0x6b   : > { %p1329_p3 = pnand %p1327_p10, %p1324_p6 }
  0x6d   : > { %1332 = shalt.err (!%p1329_p3)
}
  0x6e   : > { %s1333_s11 = scalar_lea.vmem %s308_s25, 768  ;;  %p1341_p12 = scmp.lt.s32.totalorder %s308_s25, %s308_s25 }
  0x6f   : > { %p1334_p5 = scmp.ne.s32.totalorder %s308_s25, %s1333_s11  ;;  %p1342_p0 = scmp.lt.s32.totalorder %s1333_s11, %s1333_s11 }
  0x71   : > { %p1336_p7 = pnand %p1334_p5, %p1643_p13  ;;  %p1343_p1 = por %p1342_p0, %p1341_p12 }
  0x73   : > { %p1337_p9 = pneg %p1336_p7 }
  0x75   : > { %p1344_p4 = pnand %p1343_p1, %p1337_p9 }
  0x77   : > { %1347 = shalt.err (!%p1344_p4)
}
  0x78   : > { %s1973_s8 = smov 8   ;;  %s1974_s1 = smov 128  }
  0x79   : > { %1128 = dma.hbm_to_vmem [thread:$0]  (!%p1629_p11), %s1943_s2, 768, %s308_s25, [#allocation7], %s1974_s1, %s1974_s1, %s1973_s8  }
  0x7a   : > { %s1348_s23 = scalar_lea.hbm %s1945_s4, 256 }
  0x7b   : > { %p1349_p2 = scmp.ne.s32.totalorder %s1945_s4, %s1348_s23  ;;  %p1355_p10 = scmp.lt.u32.totalorder %s1348_s23, %s1945_s4 }
  0x7d   : > { %p1351_p8 = pnand %p1349_p2, %p1643_p13 }
  0x7f   : > { %p1352_p6 = pneg %p1351_p8 }
  0x81   : > { %p1357_p3 = pnand %p1355_p10, %p1352_p6 }
  0x83   : > { %1360 = shalt.err (!%p1357_p3)
}
  0x84   : > { %s1361_s27 = scalar_lea.vmem %s334_s26, 256  ;;  %p1369_p12 = scmp.lt.s32.totalorder %s334_s26, %s334_s26 }
  0x85   : > { %p1362_p5 = scmp.ne.s32.totalorder %s334_s26, %s1361_s27  ;;  %p1370_p0 = scmp.lt.s32.totalorder %s1361_s27, %s1361_s27 }
  0x87   : > { %p1364_p7 = pnand %p1362_p5, %p1643_p13  ;;  %p1371_p1 = por %p1370_p0, %p1369_p12 }
  0x89   : > { %p1365_p9 = pneg %p1364_p7 }
  0x8b   : > { %p1372_p4 = pnand %p1371_p1, %p1365_p9 }
  0x8d   : > { %1375 = shalt.err (!%p1372_p4)
}
  0x8e   : > { %s1975_s25 = smov 64   ;;  %s187_s12 = sadd.s32 1, %s1488_s29 }
  0x8f   : > { %1134 = dma.hbm_to_vmem [thread:$0]  (!%p1629_p11), %s1945_s4, 256, %s334_s26, [#allocation10], %s1975_s25, %s1975_s25, %s1507_s5  }
  0x90   : > { %s36_s20 = sadd.s32 1, %s1496_s9  ;;  %p194_p13 = scmp.ne.s32.totalorder %s1488_s29, %s1484_s28 }
  0x91   : > { %p37_p2 = scmp.ge.s32.totalorder %s36_s20, 2  ;;  %p195_p8 = scmp.eq.s32.totalorder %s1500_s10, 0 }
  0x92   : > { %p1976_p6 = scmp.ne.s32.totalorder %s1965_s14, 0  ;;  %p1148_p3 = scmp.lt.s32.totalorder %s1500_s10, 2 }
  0x93   : > { %s1995_s20 = smov (%p37_p2, %s36_s20), 0  ;;  %p196_p5 = por %p195_p8, %p194_p13 }
  0x94   : > { %p1760_p10 = por %p1976_p6, %p194_p13  ;;  %s350_s18 = sand.u32 1, %s1488_s29  }
  0x95   : > { %s184_s21 = ssub.s32 %s1496_s9, %s1995_s20  ;;  %s1036_s5 = sshll.u32 %s350_s18, 6 }
  0x96   : > { %p185_p7 = scmp.eq.s32.totalorder %s184_s21, 0  ;;  %s1071_s26 = sshll.u32 %s1496_s9, 8 }
  0x97   : > { %s1777_s14 = scalar_lea.hbm %s1947_s6, %s1071_s26  ;;  %s354_s24 = scalar_lea.vmem [#allocation12], %s1036_s5 }
  0x98   : > { %s1772_s23 = scalar_select %p185_p7, %s1488_s29, %s187_s12  }
  0x99   : > { %s361_s11 = sshll.u32 %s354_s24, 4  ;;  %p1783_p11 = pnand %p1148_p3, %p196_p5  ;;  %s1779_s11 = int_to_ptr.vmem [resolvable:$true] %s361_s11 }
  0x9a   : > { %s1787_s25 = scalar_lea.sflag [#allocation13], %s350_s18  ;;  %s1376_s8 = scalar_lea.hbm %s1777_s14, 1024 }
  0x9b   : > { %p1377_p9 = scmp.ne.s32.totalorder %s1777_s14, %s1376_s8  ;;  %p1378_p12 = pneg %p1783_p11 }
  0x9c   : > { %s1381_s21 = scalar_lea.hbm %s1947_s6, 2048  ;;  %p1382_p4 = scmp.lt.u32.totalorder %s1777_s14, %s1947_s6 }
  0x9d   : > { %p1379_p0 = pnand %p1378_p12, %p1377_p9  ;;  %p1383_p13 = scmp.lt.u32.totalorder %s1381_s21, %s1376_s8 }
  0x9e   : > { %p1385_p8 = scmp.lt.u32.totalorder %s1376_s8, %s1777_s14 }
  0x9f   : > { %p1380_p1 = pneg %p1379_p0  ;;  %p1384_p2 = por %p1383_p13, %p1382_p4 }
  0xa1   : > { %p1386_p6 = por %p1385_p8, %p1384_p2 }
  0xa3   : > { %p1387_p3 = pnand %p1386_p6, %p1380_p1 }
  0xa5   : > { %1390 = shalt.err (!%p1387_p3)
}
  0xa6   : > { %s1391_s18 = scalar_lea.vmem %s1779_s11, 1024  ;;  %s1511_s19 = smov [#allocation12]  }
  0xa7   : > { %p1392_p5 = scmp.ne.s32.totalorder %s1779_s11, %s1391_s18  ;;  %s1396_s22 = sshll.u32 %s1511_s19, 4  ;;  %s1397_s22 = int_to_ptr.vmem [resolvable:$false] %s1396_s22 }
  0xa8   : > { %s1398_s24 = scalar_lea.vmem %s1397_s22, 2048  ;;  %p1399_p0 = scmp.lt.s32.totalorder %s1779_s11, %s1397_s22 }
  0xa9   : > { %p1394_p7 = pnand %p1392_p5, %p1378_p12  ;;  %p1400_p4 = scmp.lt.s32.totalorder %s1398_s24, %s1391_s18 }
  0xab   : > { %p1395_p9 = pneg %p1394_p7  ;;  %p1401_p13 = por %p1400_p4, %p1399_p0 }
  0xad   : > { %p1402_p2 = pnand %p1401_p13, %p1395_p9 }
  0xaf   : > { %1405 = shalt.err (!%p1402_p2)
}
  0xb0   : > { %s1512_s8 = smov 512   ;;  %s1513_s1 = smov 256  }
  0xb1   : > { %s1514_s12 = smov 16   ;;  %p1979_p12 = scmp.ne.s32.totalorder %s1969_s17, 0 }
  0xb2   : > { %1138 = dma.hbm_to_vmem [thread:$0]  (!%p1783_p11), %s1777_s14, 1024, %s1779_s11, %s1787_s25, %s1512_s8, %s1513_s1, %s1514_s12  }
  0xb3   : > { %381 = sbr.rel (%p1979_p12) target bundleno = 827 (0x33b), region = 52  ;;  %p1980_p1 = scmp.ne.s32.totalorder (!%p1979_p12), %s1964_s13, 0 }
  0xba   : > { %1459 = dma.done.wait (%p1980_p1), [#allocation4], 128  }
  0xbb   : > { %1461 = vsyncadd (%p1980_p1), [#allocation4], 4294967168 }
  0xbc   : > { %1463 = dma.done.wait (%p1980_p1), [#allocation7], 1792  }
  0xbd   : > { %1465 = vsyncadd (%p1980_p1), [#allocation7], 4294965504 }
  0xbe   : > { %1467 = dma.done.wait (%p1980_p1), [#allocation10], 512  }
  0xbf   : > { %1469 = vsyncadd (%p1980_p1), [#allocation10], 4294966784  ;;  %s1830_s17 = sand.u32 1, %s1484_s28   ;;  %p1981_p11 = scmp.ne.s32.totalorder %s1966_s15, 0 }
  0xc0   : > { %s1045_s14 = sshll.u32 %s1830_s17, 6  ;;  %s404_s11 = scalar_lea.sflag [#allocation13], %s1830_s17 }
  0xc1   : > { %s1834_s27 = scalar_lea.vmem [#allocation12], %s1045_s14 }
  0xc2   : > { %1471 = dma.done.wait (%p1981_p11), %s404_s11, 1024  }
  0xc3   : > { %1473 = vsyncadd (%p1981_p11), %s404_s11, 4294966272  ;;  %s1046_s25 = sshll.u32 %s1830_s17, 5  ;;  %s1047_s13 = sshll.u32 %s1492_s30, 2 }
  0xc4   : > { %p446_p8 = scmp.lt.s32.totalorder %s1047_s13, 7  ;;  %s1848_s18 = scalar_lea.vmem [#allocation14], %s1046_s25 }
  0xc5   : > { %p1048_p6 = scmp.ne.s32.totalorder %s1492_s30, 0 }
  0xc6   : > { %s1997_s13 = smov (!%p446_p8, %s1047_s13), 7  ;;  %v465_v0 = vlaneseq (!%p1048_p6)  ;;  %v464_v2 = vld [vmem:[#allocation3] sm:$0xff] (!%p1048_p6)  ;;  %v545_v7 = vld [vmem:[#allocation8] sm:$0xff] (!%p1048_p6)  ;;  %v546_v8 = vld [vmem:[#allocation8 + $0x8] sm:$0xff] (!%p1048_p6)  ;;  %vm529_vm0 = vcmask (!%p1048_p6), 261120   ;;  %v1515_v20 = vmov (!%p1048_p6), 0.0  }
  0xc7   : > { %s448_s26 = scalar_lea.vmem %s1948_s7, %s1997_s13  ;;  %455 = sbr.rel (%p1048_p6) target bundleno = 588 (0x24c), region = 80  ;;  %v1218_v12 = vld [vmem:[#allocation11] sm:$0xff] (!%p1048_p6)   ;;  %v547_v13 = vld [vmem:[#allocation8 + $0x10] sm:$0xff] (!%p1048_p6)  ;;  %v548_v16 = vld [vmem:[#allocation8 + $0x18] sm:$0xff] (!%p1048_p6)  ;;  %v551_v18 = vsel (!%p1048_p6), %vm529_vm0, %v545_v7, 0.0  ;;  %v552_v19 = vsel (!%p1048_p6), %vm529_vm0, %v546_v8, 0.0  ;;  %1079 = vmatprep.subr.bf16.mxu0 (!%p1048_p6), %v1515_v20  ;;  %1087 = vmatprep.subr.bf16.mxu1 (!%p1048_p6), %v1515_v20 }
  0xc8   : > { %v466_v1 = vshrl.u32 (!%p1048_p6), %v465_v0, 7  ;;  %v1219_v21 = vld [vmem:[#allocation9] sm:$0xff] (!%p1048_p6)   ;;  %v549_v22 = vld [vmem:[#allocation8 + $0x20] sm:$0xff] (!%p1048_p6)  ;;  %v553_v23 = vadd.f32 (!%p1048_p6), %v552_v19, %v551_v18  ;;  %v554_v24 = vsel (!%p1048_p6), %vm529_vm0, %v547_v13, 0.0  ;;  %1080 = vmatpush3.bf16.msra.mxu0 (!%p1048_p6), %v1218_v12  ;;  %v1220_v25 = vld [vmem:[#allocation11 + $0x8] sm:$0xff] (!%p1048_p6)   ;;  %v556_v26 = vsel (!%p1048_p6), %vm529_vm0, %v548_v16, 0.0 }
  0xc9   : > { %1081 = vmatprep.subr.bf16.mxu0 (!%p1048_p6), %v1515_v20  ;;  %1088 = vmatpush3.bf16.msra.mxu1 (!%p1048_p6), %v1219_v21  ;;  %v550_v28 = vld [vmem:[#allocation8 + $0x28] sm:$0xff] (!%p1048_p6)  ;;  %v558_v33 = vsel (!%p1048_p6), %vm529_vm0, %v549_v22, 0.0  ;;  %v1221_v35 = vld [vmem:[#allocation9 + $0x8] sm:$0xff] (!%p1048_p6)   ;;  %vm1516_vm1 = vmmov (!%p1048_p6), 0   ;;  %v456_v44 = vld [vmem:[#allocation6] sm:$0xff] (!%p1048_p6)  ;;  %s1982_s22 = sld [smem:[#allocation23_spill]] (!%p1048_p6) }
  0xca   : > { %v467_v3 = vsub.s32 (!%p1048_p6), 0, %v466_v1  ;;  %v481_v4 = vsub.s32 (!%p1048_p6), 2, %v466_v1  ;;  %v474_v5 = vsub.s32 (!%p1048_p6), 1, %v466_v1  ;;  %v488_v6 = vsub.s32 (!%p1048_p6), 3, %v466_v1  ;;  %1089 = vmatprep.subr.bf16.mxu1 (!%p1048_p6), %v1515_v20  ;;  %1083 = vmatprep.mubr.msk.bf16.mxu0 (!%p1048_p6), %vm1516_vm1, %v1515_v20  ;;  %v458_v46 = vld [vmem:[#allocation6 + $0x10] sm:$0xff] (!%p1048_p6)  ;;  %v457_v47 = vld [vmem:[#allocation6 + $0x8] sm:$0xff] (!%p1048_p6) }
  0xcb   : > { %v495_v11 = vsub.s32 (!%p1048_p6), 4, %v466_v1  ;;  %v502_v15 = vsub.s32 (!%p1048_p6), 5, %v466_v1  ;;  %v509_v27 = vsub.s32 (!%p1048_p6), 6, %v466_v1  ;;  %v555_v29 = vadd.f32 (!%p1048_p6), %v554_v24, %v553_v23  ;;  %1091 = vmatprep.mubr.msk.bf16.mxu1 (!%p1048_p6), %vm1516_vm1, %v1515_v20  ;;  %v459_v48 = vld [vmem:[#allocation6 + $0x18] sm:$0xff] (!%p1048_p6)  ;;  %v460_v55 = vld [vmem:[#allocation6 + $0x20] sm:$0xff] (!%p1048_p6)  ;;  %v461_v56 = vld [vmem:[#allocation6 + $0x28] sm:$0xff] (!%p1048_p6) }
  0xcc   : > { %v468_v9 = vrot.slane (!%p1048_p6), %v464_v2, %v467_v3  ;;  %v482_v10 = vrot.slane (!%p1048_p6), %v464_v2, %v481_v4  ;;  %v475_v14 = vrot.slane (!%p1048_p6), %v464_v2, %v474_v5  ;;  %v489_v17 = vrot.slane (!%p1048_p6), %v464_v2, %v488_v6  ;;  %1082 = vmatpush3.bf16.msra.mxu0 (!%p1048_p6), %v1220_v25  ;;  %v462_v3 = vld [vmem:[#allocation6 + $0x30] sm:$0xff] (!%p1048_p6)  ;;  %v463_v4 = vld [vmem:[#allocation6 + $0x38] sm:$0xff] (!%p1048_p6) }
  0xcd   : > { %v496_v30 = vrot.slane (!%p1048_p6), %v464_v2, %v495_v11  ;;  %v503_v31 = vrot.slane (!%p1048_p6), %v464_v2, %v502_v15  ;;  %v516_v32 = vsub.s32 (!%p1048_p6), 7, %v466_v1  ;;  %v557_v34 = vadd.f32 (!%p1048_p6), %v556_v26, %v555_v29  ;;  %1090 = vmatpush3.bf16.msra.mxu1 (!%p1048_p6), %v1221_v35 }
  0xce   : > { %470 = vbcast.lane.b32.xlu0 %v468_v9, 256  ;;  %484 = vbcast.lane.b32.xlu1 %v482_v10, 256  ;;  %v560_v36 = vsel %vm529_vm0, %v550_v28, 0.0  ;;  %v510_v38 = vrot.slane %v464_v2, %v509_v27  ;;  %vm701_vm2 = vcmask 257024  }
  0xcf   : > { %v559_v37 = vadd.f32 %v558_v33, %v557_v34  ;;  %v517_v39 = vrot.slane %v464_v2, %v516_v32  ;;  %v1055_v24 = vld [vmem:[%s1982_s22] ss:$0 sm:$0xff] }
  0xd1   : > { %v561_v40 = vadd.f32 %v560_v36, %v559_v37 }
  0xd2   : > { %477 = vbcast.lane.b32.xlu0 %v475_v14, 256  ;;  %491 = vbcast.lane.b32.xlu1 %v489_v17, 256 }
  0xd3   : > { %v562_v41 = vmul.f32 0.16666667, %v561_v40 }
  0xd5   : > { %v568_v42 = vpack.c.bf16 %v562_v41, %v562_v41 }
  0xd6   : > { %498 = vbcast.lane.b32.xlu0 %v496_v30, 256  ;;  %505 = vbcast.lane.b32.xlu1 %v503_v31, 256 }
  0xd7   : > { %1084 = vmatmul.mubr.msk.bf16.vlgmr.msra.gmra.mrb[0].mxu0 %vm529_vm0, %v568_v42 }
  0xda   : > { %512 = vbcast.lane.b32.xlu0 %v510_v38, 256  ;;  %519 = vbcast.lane.b32.xlu1 %v517_v39, 256 }
 0x140   : > { %v471_v43 = vpop.permute.xlu0 %470  ;;  %v485_v45 = vpop.permute.xlu1 %484 }
 0x141   : > { %v521_v49 = vmul.f32 %v471_v43, %v456_v44  ;;  %v523_v52 = vmul.f32 %v485_v45, %v458_v46 }
 0x143   : > { %v530_v57 = vsel %vm529_vm0, %v521_v49, 0.0  ;;  %v533_v62 = vsel %vm529_vm0, %v523_v52, 0.0 }
 0x144   : > { %v478_v50 = vpop.permute.xlu0 %477  ;;  %v492_v51 = vpop.permute.xlu1 %491 }
 0x145   : > { %v522_v53 = vmul.f32 %v478_v50, %v457_v47  ;;  %v524_v54 = vmul.f32 %v492_v51, %v459_v48 }
 0x147   : > { %v531_v58 = vsel %vm529_vm0, %v522_v53, 0.0  ;;  %v535_v63 = vsel %vm529_vm0, %v524_v54, 0.0 }
 0x148   : > { %v532_v59 = vadd.f32 %v531_v58, %v530_v57  ;;  %v499_v60 = vpop.permute.xlu0 %498  ;;  %v506_v61 = vpop.permute.xlu1 %505 }
 0x149   : > { %v525_v0 = vmul.f32 %v499_v60, %v460_v55  ;;  %v526_v1 = vmul.f32 %v506_v61, %v461_v56 }
 0x14a   : > { %v534_v2 = vadd.f32 %v533_v62, %v532_v59 }
 0x14b   : > { %v537_v5 = vsel %vm529_vm0, %v525_v0, 0.0  ;;  %v539_v9 = vsel %vm529_vm0, %v526_v1, 0.0 }
 0x14c   : > { %v536_v6 = vadd.f32 %v535_v63, %v534_v2  ;;  %v513_v7 = vpop.permute.xlu0 %512  ;;  %v520_v8 = vpop.permute.xlu1 %519 }
 0x14d   : > { %v527_v10 = vmul.f32 %v513_v7, %v462_v3  ;;  %v528_v11 = vmul.f32 %v520_v8, %v463_v4 }
 0x14e   : > { %v538_v12 = vadd.f32 %v537_v5, %v536_v6 }
 0x14f   : > { %v541_v13 = vsel %vm529_vm0, %v527_v10, 0.0  ;;  %v543_v15 = vsel %vm529_vm0, %v528_v11, 0.0 }
 0x150   : > { %v540_v14 = vadd.f32 %v539_v9, %v538_v12 }
 0x152   : > { %v542_v16 = vadd.f32 %v541_v13, %v540_v14 }
 0x154   : > { %v544_v17 = vadd.f32 %v543_v15, %v542_v16 }
 0x156   : > { %v563_v18 = vpack.c.bf16 %v544_v17, %v544_v17 }
 0x158   : > { %1092 = vmatmul.mubr.msk.bf16.vlgmr.msra.gmra.mrb[0].mxu1 %vm529_vm0, %v563_v18 }
 0x1aa   : > { %v622_v19 = vpop.f32.mrb[0].mxu0 }
 0x1ab   : > { %v1085_v20 = vpop.f32.mrb[1].mxu0 }
 0x1ac   : > { %v625_v21 = vpop.f32.mrb[2].mxu0 }
 0x1ad   : > { %v1086_v22 = vpop.f32.mrb[3].mxu0 }
 0x22b   : > { %v677_v23 = vpop.f32.mrb[0].mxu1 }
 0x22c   : > { %v678_v25 = vadd.f32 %v677_v23, %v622_v19  ;;  %v1093_v26 = vpop.f32.mrb[1].mxu1 }
 0x22d   : > { %v680_v27 = vpop.f32.mrb[2].mxu1 }
 0x22e   : > { %v690_v28 = vadd.f32 %v1055_v24, %v678_v25  ;;  %v1094_v29 = vpop.f32.mrb[3].mxu1 }
 0x230   : > { %v692_v30 = vmul.f32 0.044715, %v690_v28  ;;  %v691_v36 = vmul.f32 0.5, %v690_v28 }
 0x232   : > { %v693_v31 = vmul.f32 %v692_v30, %v690_v28 }
 0x234   : > { %v694_v32 = vmul.f32 %v693_v31, %v690_v28 }
 0x236   : > { %v695_v33 = vadd.f32 %v694_v32, %v690_v28 }
 0x238   : > { %v696_v34 = vmul.f32 0.7978846, %v695_v33 }
 0x23a   : > { %1222 = vtanh.f32 %v696_v34 }
 0x244   : > { %v1223_v35 = vpop.eup %1222 }
 0x245   : > { %v698_v37 = vadd.f32 1.0, %v1223_v35 }
 0x247   : > { %v699_v38 = vmul.f32 %v698_v37, %v691_v36 }
 0x249   : > { %v700_v39 = vpack.c.bf16 %v699_v38, %v699_v38 }
 0x24b   : > { %702 = vst.msk [vmem:[#allocation2] sm:$0xf] %vm701_vm2, %v700_v39 }
 0x24c PF: > { %v1224_v40 = vld [vmem:[%s1834_s27 + $0x4] ss:$16 sps:$4 sm:$0xff]   ;;  %v1226_v41 = vld [vmem:[%s1834_s27 + $0xc] ss:$16 sps:$4 sm:$0xff]   ;;  %v1517_v42 = vmov 0   ;;  %vm774_vm3 = vcmask 261120   ;;  %v714_v50 = vlaneseq }
 0x24d   : > { %810 = vmatprep.mubr.bf16.mxu0 %v1517_v42  ;;  %851 = vmatprep.mubr.bf16.mxu1 %v1517_v42  ;;  %v1228_v43 = vld [vmem:[%s1834_s27] ss:$16 sps:$4 sm:$0xff]   ;;  %v1229_v44 = vld [vmem:[%s1834_s27 + $0x8] ss:$16 sps:$4 sm:$0xff]   ;;  %v1230_v45 = vld [vmem:[%s1834_s27 + $0x24] ss:$16 sps:$4 sm:$0xff]  }
 0x24e   : > { %778 = vmatprep.subr.bf16.mxu0 %v1224_v40  ;;  %819 = vmatprep.subr.bf16.mxu1 %v1226_v41  ;;  %v1232_v46 = vld [vmem:[%s1834_s27 + $0x2c] ss:$16 sps:$4 sm:$0xff]   ;;  %v1234_v47 = vld [vmem:[%s1834_s27 + $0x20] ss:$16 sps:$4 sm:$0xff]   ;;  %v1235_v48 = vld [vmem:[%s1834_s27 + $0x28] ss:$16 sps:$4 sm:$0xff]  }
 0x24f   : > { %779 = vmatpush1.bf16.msra.mxu0 %v1228_v43  ;;  %820 = vmatpush1.bf16.msra.mxu1 %v1229_v44  ;;  %v715_v51 = vshrl.u32 %v714_v50, 7  ;;  %v712_v54 = vld [vmem:[%s448_s26] sm:$0xf]  ;;  %s1072_s1 = sshll.u32 %s1492_s30, 9  ;;  %s881_s12 = sshll.u32 %s1848_s18, 4  ;;  %s1890_s12 = int_to_ptr.vmem [resolvable:$true] %s881_s12 }
 0x250   : > { %780 = vmatprep.subr.bf16.mxu0 %v1230_v45  ;;  %821 = vmatprep.subr.bf16.mxu1 %v1232_v46  ;;  %s1983_s27 = sld [smem:[#allocation24_spill]]  ;;  %s865_s30 = scalar_lea.sflag [#allocation5], %s1830_s17 }
 0x251   : > { %v716_v52 = vsub.s32 0, %v715_v51  ;;  %v724_v53 = vsub.s32 2, %v715_v51  ;;  %v720_v55 = vsub.s32 1, %v715_v51  ;;  %v728_v56 = vsub.s32 3, %v715_v51  ;;  %s1406_s21 = scalar_lea.vmem %s1890_s12, 512  ;;  %s1518_s5 = smov [#allocation14]  }
 0x252   : > { %v703_v49 = vld [vmem:[#allocation2] sm:$0xf]  ;;  %p1407_p3 = scmp.ne.s32.totalorder %s1890_s12, %s1406_s21  ;;  %s1410_s26 = sshll.u32 %s1518_s5, 4  ;;  %s1411_s26 = int_to_ptr.vmem [resolvable:$false] %s1410_s26 }
 0x253   : > { %781 = vmatpush1.bf16.msra.mxu0 %v1234_v47  ;;  %822 = vmatpush1.bf16.msra.mxu1 %v1235_v48  ;;  %v717_v57 = vrot.slane %v712_v54, %v716_v52  ;;  %v725_v58 = vrot.slane %v712_v54, %v724_v53  ;;  %v721_v59 = vrot.slane %v712_v54, %v720_v55  ;;  %s1412_s15 = scalar_lea.vmem %s1411_s26, 1024  ;;  %p1413_p9 = scmp.lt.s32.totalorder %s1890_s12, %s1411_s26 }
 0x254   : > { %v729_v60 = vrot.slane %v712_v54, %v728_v56  ;;  %p1408_p5 = pnand %p1407_p3, %p1760_p10  ;;  %p1414_p0 = scmp.lt.s32.totalorder %s1412_s15, %s1406_s21 }
 0x256   : > { %1064 = vmatmul.mubr.msk.bf16.vlgmr.msra.gmra.mrb[0].mxu0 %vm774_vm3, %v703_v49  ;;  %1065 = vmatmul.mubr.msk.bf16.vlgmr.msra.gmra.mrb[0].mxu1 %vm774_vm3, %v703_v49  ;;  %s1984_s25 = smov %s1983_s27  ;;  %s1888_s13 = scalar_lea.hbm %s1983_s27, %s1072_s1 }
 0x257   : > { %p1409_p7 = pneg %p1408_p5  ;;  %p1415_p4 = por %p1414_p0, %p1413_p9 }
 0x259   : > { %p1416_p13 = pnand %p1415_p4, %p1409_p7 }
 0x329   : > { %v812_v61 = vpop.f32.mrb[0].mxu0  ;;  %v853_v62 = vpop.f32.mrb[0].mxu1 }
 0x32a   : > { %v813_v63 = vadd.f32 %v812_v61, %v717_v57  ;;  %v854_v0 = vadd.f32 %v853_v62, %v725_v58  ;;  %v814_v1 = vpop.f32.mrb[1].mxu0  ;;  %v855_v2 = vpop.f32.mrb[1].mxu1 }
 0x32b   : > { %v815_v3 = vadd.f32 %v814_v1, %v721_v59  ;;  %v856_v4 = vadd.f32 %v855_v2, %v729_v60  ;;  %v816_v5 = vpop.f32.mrb[2].mxu0  ;;  %v857_v6 = vpop.f32.mrb[2].mxu1 }
 0x32c   : > { %860 = vst [vmem:[%s1848_s18] sm:$0xff] %v813_v63  ;;  %862 = vst [vmem:[%s1848_s18 + $0x10] sm:$0xff] %v854_v0  ;;  %v817_v7 = vpop.f32.mrb[3].mxu0  ;;  %v858_v8 = vpop.f32.mrb[3].mxu1 }
 0x32d   : > { %861 = vst [vmem:[%s1848_s18 + $0x8] sm:$0xff] %v815_v3  ;;  %863 = vst [vmem:[%s1848_s18 + $0x18] sm:$0xff] %v856_v4 }
 0x32e   : > { %1419 = shalt.err (!%p1416_p13)
}
 0x32f   : > { %s1420_s17 = scalar_lea.hbm %s1888_s13, 512  ;;  %s1424_s22 = scalar_lea.hbm %s1984_s25, 1024 }
 0x330   : > { %p1421_p2 = scmp.ne.s32.totalorder %s1888_s13, %s1420_s17  ;;  %p1425_p11 = scmp.lt.u32.totalorder %s1888_s13, %s1984_s25 }
 0x331   : > { %p1426_p8 = scmp.lt.u32.totalorder %s1424_s22, %s1420_s17  ;;  %p1428_p3 = scmp.lt.u32.totalorder %s1420_s17, %s1888_s13 }
 0x332   : > { %p1422_p12 = pnand %p1421_p2, %p1760_p10 }
 0x333   : > { %p1427_p6 = por %p1426_p8, %p1425_p11 }
 0x334   : > { %p1423_p1 = pneg %p1422_p12 }
 0x335   : > { %p1429_p5 = por %p1428_p3, %p1427_p6 }
 0x337   : > { %p1430_p7 = pnand %p1429_p5, %p1423_p1 }
 0x339   : > { %1433 = shalt.err (!%p1430_p7)
}
 0x33a   : > { %1117 = dma.vmem_to_hbm [thread:$0]  (%p1760_p10), %s1890_s12, 512, %s1888_s13, %s865_s30  }
 0x33b PF: > { %s1985_s1 = sld [smem:[#allocation20_spill]]  ;;  %s1986_s14 = sld [smem:[#allocation21_spill]] }
 0x33c   : > { %p1988_p0 = scmp.ge.s32.totalorder %s1500_s10, 2 }
 0x341   : > { %s893_s11 = sand.u32 1, %s1985_s1   ;;  %p1987_p9 = scmp.ne.s32.totalorder %s1986_s14, 0 }
 0x342   : > { %s894_s27 = scalar_lea.sflag [#allocation5], %s893_s11 }
 0x343   : > { %p1140_p4 = pnand %p1988_p0, %p1987_p9 }
 0x345   : > { %1475 = dma.done.wait (!%p1140_p4), %s894_s27, 512  }
 0x346   : > { %1477 = vsyncadd (!%p1140_p4), %s894_s27, 4294966784  ;;  %s27_s10 = sadd.s32 1, %s1500_s10   ;;  %s1989_s27 = smov %s1484_s28 }
 0x347   : > { %p24_p13 = scmp.ge.s32.totalorder %s27_s10, 4   ;;  %s1990_s28 = smov %s1488_s29 }
 0x348   : > { %s1991_s29 = smov %s1772_s23  ;;  %s1992_s30 = smov %s1496_s9 }
 0x349   : > { %s1993_s9 = smov %s1995_s20  ;;  %26 = sbr.rel (!%p24_p13) target bundleno = 13 (0xd), region = 128 }
 0x350   :  { %899 = vsyncpa [#allocation4], 1 }
 0x351   :  { %901 = vsyncpa [#allocation4 + $0x1], 1 }
 0x352   :  { %902 = vsyncpa [#allocation7], 1 }
 0x353   :  { %903 = vsyncpa [#allocation10], 1 }
 0x354   :  { %904 = vsyncpa [#allocation13], 1 }
 0x355   :  { %906 = vsyncpa [#allocation13 + $0x1], 1 }
 0x356   :  { %907 = vsyncpa [#allocation5], 1 }
 0x357   :  { %909 = vsyncpa [#allocation5 + $0x1], 1 }

</bundles_post_ra>
